<compile_context>
chip_gen: v6e
topology: v6e:2x2x1
jax: 0.10.0
libtpu: 0.0.40
codegen_flags: <defaults>
</compile_context>

<pallas_src>
import jax
import jax.numpy as jnp
from jax.experimental import pallas as pl
from jax.experimental.pallas import tpu as pltpu

EPS = 1e-5


def _round_up(x, m):
    return (x + m - 1) // m * m


def critic_fused_kernel(x_ref, ea_ref,
                        s0_ref, t0_ref,
                        w1_ref, b1_ref,
                        w2_ref, b2_ref,
                        w3_ref, b3_ref,
                        w4_ref, b4_ref,
                        o_ref):
    """Fused Critic forward for one batch tile (all BN folded, eval mode)."""
    # input_norm (eval BN) + stage embedding, folded to one scale/shift.
    h = x_ref[...] * s0_ref[...] + t0_ref[...]
    # layer1 (SlimmableBlock at fixed stage): Linear+BN folded, then ReLU.
    h = jnp.dot(h, w1_ref[...], preferred_element_type=jnp.float32) + b1_ref[...]
    h = jnp.maximum(h, 0.0)
    # + action embedding (gathered in the wrapper, zero-padded lanes).
    h = h + ea_ref[...]
    # layer2: Linear+BN folded, ReLU.
    h = jnp.dot(h, w2_ref[...], preferred_element_type=jnp.float32) + b2_ref[...]
    h = jnp.maximum(h, 0.0)
    # layer3: Linear+BN folded, ReLU.
    h = jnp.dot(h, w3_ref[...], preferred_element_type=jnp.float32) + b3_ref[...]
    h = jnp.maximum(h, 0.0)
    # last_layer: plain Linear (output padded to 128 lanes, sliced outside).
    o_ref[...] = (jnp.dot(h, w4_ref[...], preferred_element_type=jnp.float32)
                  + b4_ref[...]).astype(o_ref.dtype)


def _fold_linear_bn(weight, bias, gamma, beta, mean, var, eps=EPS):
    """Fold an eval-mode BN into a Linear: returns W_t [in, out], b [out]."""
    inv_std = 1.0 / jnp.sqrt(var + eps)
    scale = gamma * inv_std
    w_t = weight.T * scale[None, :]
    b = bias * scale + (beta - mean * scale)
    return w_t, b


def _pad2(a, rows, cols):
    return jnp.pad(a, ((0, rows - a.shape[0]), (0, cols - a.shape[1])))


def prepare_critic_params(params, stage, n_state):
    """One-time prep: fold BN stats + stage embedding into the linear layers,
    transpose weights to [in, out], pad all feature dims to 128 lanes."""
    S = n_state
    SP = _round_up(S, 128)
    F1 = params["l1_w"].shape[0]          # 64
    F1P = _round_up(F1, 128)
    F2 = params["l2_w"].shape[0]          # 128
    F2P = _round_up(F2, 128)
    F3 = params["l3_w"].shape[0]          # 256
    F3P = _round_up(F3, 128)
    OUT = params["l4_w"].shape[0]         # 1
    OUTP = _round_up(OUT, 128)

    # input_norm (stage-specific running stats) folded; stage embedding row is
    # batch-constant so it folds into the shift.
    inv0 = 1.0 / jnp.sqrt(params["in_var"] + EPS)
    scale0 = params["in_gamma"] * inv0
    shift0 = (params["in_beta"] - params["in_mean"] * scale0
              + params["emb_stage"][stage, :S])
    scale0 = _pad2(scale0[None, :], 1, SP)
    shift0 = _pad2(shift0[None, :], 1, SP)

    w1, b1 = _fold_linear_bn(params["l1_w"], params["l1_b"],
                             params["bn1_g"], params["bn1_b"],
                             params["bn1_m"], params["bn1_v"])
    w1 = _pad2(w1, SP, F1P)
    b1 = _pad2(b1[None, :], 1, F1P)

    w2, b2 = _fold_linear_bn(params["l2_w"], params["l2_b"],
                             params["bn2_g"], params["bn2_b"],
                             params["bn2_m"], params["bn2_v"])
    w2 = _pad2(w2, F1P, F2P)
    b2 = _pad2(b2[None, :], 1, F2P)

    w3, b3 = _fold_linear_bn(params["l3_w"], params["l3_b"],
                             params["bn3_g"], params["bn3_b"],
                             params["bn3_m"], params["bn3_v"])
    w3 = _pad2(w3, F2P, F3P)
    b3 = _pad2(b3[None, :], 1, F3P)

    w4 = _pad2(params["l4_w"].T, F3P, OUTP)
    b4 = _pad2(params["l4_b"][None, :], 1, OUTP)

    emb_action = _pad2(params["emb_action"], params["emb_action"].shape[0], F1P)

    return dict(scale0=scale0, shift0=shift0,
                w1=w1, b1=b1, w2=w2, b2=b2, w3=w3, b3=b3, w4=w4, b4=b4,
                emb_action=emb_action,
                dims=(S, SP, F1P, F2P, F3P, OUT, OUTP))


def critic_forward(obs, action, prep, *, tile_b=512):
    """obs: [B, n_state] f32, action: [B] (or [B,1]) int. Returns [B, 1]."""
    S, SP, F1P, F2P, F3P, OUT, OUTP = prep["dims"]
    B = obs.shape[0]
    TB = min(_round_up(B, 8), tile_b)          # batch tile (sublane multiple)
    BP = _round_up(B, TB)

    x = jnp.pad(obs.astype(jnp.float32), ((0, BP - B), (0, SP - S)))
    # Data-dependent embedding gather done in the wrapper (see TODO above).
    ea = jnp.take(prep["emb_action"],
                  action.reshape(-1).astype(jnp.int32), axis=0)
    ea = jnp.pad(ea, ((0, BP - B), (0, 0)))

    batch = lambda i: (i, 0)   # tiled over batch
    const = lambda i: (0, 0)   # VMEM-resident across batch tiles

    out = pl.pallas_call(
        critic_fused_kernel,
        out_shape=jax.ShapeDtypeStruct((BP, OUTP), jnp.float32),
        grid=(BP // TB,),
        in_specs=[
            pl.BlockSpec((TB, SP), batch),      # obs tile
            pl.BlockSpec((TB, F1P), batch),     # action-embedding tile
            pl.BlockSpec((1, SP), const),       # input-norm scale
            pl.BlockSpec((1, SP), const),       # input-norm shift (+stage emb)
            pl.BlockSpec((SP, F1P), const),     # layer1 folded weight
            pl.BlockSpec((1, F1P), const),      # layer1 folded bias
            pl.BlockSpec((F1P, F2P), const),    # layer2 folded weight
            pl.BlockSpec((1, F2P), const),      # layer2 folded bias
            pl.BlockSpec((F2P, F3P), const),    # layer3 folded weight
            pl.BlockSpec((1, F3P), const),      # layer3 folded bias
            pl.BlockSpec((F3P, OUTP), const),   # last_layer weight
            pl.BlockSpec((1, OUTP), const),     # last_layer bias
        ],
        out_specs=pl.BlockSpec((TB, OUTP), batch),
        compiler_params=pltpu.CompilerParams(
            dimension_semantics=("parallel",),
            vmem_limit_bytes=32 * 1024 * 1024),
    )(x, ea, prep["scale0"], prep["shift0"],
      prep["w1"], prep["b1"], prep["w2"], prep["b2"],
      prep["w3"], prep["b3"], prep["w4"], prep["b4"])

    return out[:B, :OUT]


def critic_reference(obs, action, stage, p):
    """Pure-JAX reference following the original module's op order."""
    S = obs.shape[1]
    x = ((obs - p["in_mean"]) / jnp.sqrt(p["in_var"] + EPS)
         * p["in_gamma"] + p["in_beta"])
    x = x + p["emb_stage"][stage, :S]

    def block(h, w, b, g, be, m, v):
        h = h @ w.T + b
        h = (h - m) / jnp.sqrt(v + EPS) * g + be
        return jnp.maximum(h, 0.0)

    h = block(x, p["l1_w"], p["l1_b"],
              p["bn1_g"], p["bn1_b"], p["bn1_m"], p["bn1_v"])
    h = h + p["emb_action"][action.reshape(-1)]
    h = block(h, p["l2_w"], p["l2_b"],
              p["bn2_g"], p["bn2_b"], p["bn2_m"], p["bn2_v"])
    h = block(h, p["l3_w"], p["l3_b"],
              p["bn3_g"], p["bn3_b"], p["bn3_m"], p["bn3_v"])
    return h @ p["l4_w"].T + p["l4_b"]


if __name__ == "__main__":
    key = jax.random.PRNGKey(0)
    num_state = [24, 32]
    stage = 1
    n_state = num_state[stage]       # 32
    num_feat = 64
    num_actions = 100
    B = 8

    keys = iter(jax.random.split(key, 32))

    def nrm(shape, s=1.0):
        return s * jax.random.normal(next(keys), shape, dtype=jnp.float32)

    params = dict(
        emb_stage=nrm((2, max(num_state)), 0.1),
        in_gamma=1.0 + nrm((n_state,), 0.1),
        in_beta=nrm((n_state,), 0.1),
        in_mean=nrm((n_state,), 0.1),
        in_var=jnp.abs(1.0 + nrm((n_state,), 0.1)),
        l1_w=nrm((num_feat, n_state), 0.1),
        l1_b=nrm((num_feat,), 0.1),
        bn1_g=1.0 + nrm((num_feat,), 0.1),
        bn1_b=nrm((num_feat,), 0.1),
        bn1_m=nrm((num_feat,), 0.1),
        bn1_v=jnp.abs(1.0 + nrm((num_feat,), 0.1)),
        emb_action=nrm((num_actions, num_feat), 0.1),
        l2_w=nrm((2 * num_feat, num_feat), 0.1),
        l2_b=nrm((2 * num_feat,), 0.1),
        bn2_g=1.0 + nrm((2 * num_feat,), 0.1),
        bn2_b=nrm((2 * num_feat,), 0.1),
        bn2_m=nrm((2 * num_feat,), 0.1),
        bn2_v=jnp.abs(1.0 + nrm((2 * num_feat,), 0.1)),
        l3_w=nrm((4 * num_feat, 2 * num_feat), 0.1),
        l3_b=nrm((4 * num_feat,), 0.1),
        bn3_g=1.0 + nrm((4 * num_feat,), 0.1),
        bn3_b=nrm((4 * num_feat,), 0.1),
        bn3_m=nrm((4 * num_feat,), 0.1),
        bn3_v=jnp.abs(1.0 + nrm((4 * num_feat,), 0.1)),
        l4_w=nrm((1, 4 * num_feat), 0.1),
        l4_b=nrm((1,), 0.1),
    )

    obs = jax.random.normal(next(keys), (B, n_state), dtype=jnp.float32)
    action = jax.random.randint(next(keys), (B,), 0, num_actions,
                                dtype=jnp.int32)

    prep = prepare_critic_params(params, stage, n_state)   # one-time prep
    out = critic_forward(obs, action, prep)
    out = jax.block_until_ready(out)

    ref = critic_reference(obs, action, stage, params)
    assert out.shape == (B, 1), out.shape
    max_diff = jnp.max(jnp.abs(out - ref))
    assert jnp.allclose(out, ref, atol=1e-4, rtol=1e-4), (
        f"mismatch vs reference, max abs diff = {max_diff}")

    print("KERNEL_OK")
</pallas_src>

<mosaic_0001>
module attributes {stable_mosaic.version = 11 : i64} {
  func.func @critic_fused_kernel(%arg0: i32, %arg1: memref<8x128xf32, #tpu.memory_space<vmem>>, %arg2: memref<8x128xf32, #tpu.memory_space<vmem>>, %arg3: memref<1x128xf32, #tpu.memory_space<vmem>>, %arg4: memref<1x128xf32, #tpu.memory_space<vmem>>, %arg5: memref<128x128xf32, #tpu.memory_space<vmem>>, %arg6: memref<1x128xf32, #tpu.memory_space<vmem>>, %arg7: memref<128x128xf32, #tpu.memory_space<vmem>>, %arg8: memref<1x128xf32, #tpu.memory_space<vmem>>, %arg9: memref<128x256xf32, #tpu.memory_space<vmem>>, %arg10: memref<1x256xf32, #tpu.memory_space<vmem>>, %arg11: memref<256x128xf32, #tpu.memory_space<vmem>>, %arg12: memref<1x128xf32, #tpu.memory_space<vmem>>, %arg13: memref<8x128xf32, #tpu.memory_space<vmem>>) attributes {dimension_semantics = [#tpu.dimension_semantics<parallel>], iteration_bounds = array<i64: 1>, scalar_prefetch = 0 : i64, scratch_operands = 0 : i64, tpu.core_type = #tpu.core_type<tc>, window_params = [{transform_indices = @transform_0, window_bounds = array<i64: 8, 128>}, {transform_indices = @transform_1, window_bounds = array<i64: 8, 128>}, {pipeline_mode = #tpu.pipeline_mode<synchronous>, transform_indices = @transform_2, window_bounds = array<i64: 1, 128>}, {pipeline_mode = #tpu.pipeline_mode<synchronous>, transform_indices = @transform_3, window_bounds = array<i64: 1, 128>}, {pipeline_mode = #tpu.pipeline_mode<synchronous>, transform_indices = @transform_4, window_bounds = array<i64: 128, 128>}, {pipeline_mode = #tpu.pipeline_mode<synchronous>, transform_indices = @transform_5, window_bounds = array<i64: 1, 128>}, {pipeline_mode = #tpu.pipeline_mode<synchronous>, transform_indices = @transform_6, window_bounds = array<i64: 128, 128>}, {pipeline_mode = #tpu.pipeline_mode<synchronous>, transform_indices = @transform_7, window_bounds = array<i64: 1, 128>}, {pipeline_mode = #tpu.pipeline_mode<synchronous>, transform_indices = @transform_8, window_bounds = array<i64: 128, 256>}, {pipeline_mode = #tpu.pipeline_mode<synchronous>, transform_indices = @transform_9, window_bounds = array<i64: 1, 256>}, {pipeline_mode = #tpu.pipeline_mode<synchronous>, transform_indices = @transform_10, window_bounds = array<i64: 256, 128>}, {pipeline_mode = #tpu.pipeline_mode<synchronous>, transform_indices = @transform_11, window_bounds = array<i64: 1, 128>}, {transform_indices = @transform_12, window_bounds = array<i64: 8, 128>}]} {
    %c0 = arith.constant 0 : index
    %c0_0 = arith.constant 0 : index
    %0 = vector.load %arg1[%c0, %c0_0] : memref<8x128xf32, #tpu.memory_space<vmem>>, vector<8x128xf32>
    %c0_1 = arith.constant 0 : index
    %c0_2 = arith.constant 0 : index
    %1 = vector.load %arg3[%c0_1, %c0_2] : memref<1x128xf32, #tpu.memory_space<vmem>>, vector<1x128xf32>
    %2 = vector.broadcast %1 : vector<1x128xf32> to vector<8x128xf32>
    %3 = arith.mulf %0, %2 : vector<8x128xf32>
    %c0_3 = arith.constant 0 : index
    %c0_4 = arith.constant 0 : index
    %4 = vector.load %arg4[%c0_3, %c0_4] : memref<1x128xf32, #tpu.memory_space<vmem>>, vector<1x128xf32>
    %5 = vector.broadcast %4 : vector<1x128xf32> to vector<8x128xf32>
    %6 = arith.addf %3, %5 : vector<8x128xf32>
    %c0_5 = arith.constant 0 : index
    %c0_6 = arith.constant 0 : index
    %7 = vector.load %arg5[%c0_5, %c0_6] : memref<128x128xf32, #tpu.memory_space<vmem>>, vector<128x128xf32>
    %cst = arith.constant dense<0.000000e+00> : vector<8x128xf32>
    %8 = tpu.matmul %6, %7, %cst {dimension_numbers = #tpu.dot_dimension_numbers<[1], [0], [0], [1], [0, 0, 1, 1], [], []>} : vector<8x128xf32>, vector<128x128xf32>, vector<8x128xf32> -> vector<8x128xf32>
    %c0_7 = arith.constant 0 : index
    %c0_8 = arith.constant 0 : index
    %9 = vector.load %arg6[%c0_7, %c0_8] : memref<1x128xf32, #tpu.memory_space<vmem>>, vector<1x128xf32>
    %10 = vector.broadcast %9 : vector<1x128xf32> to vector<8x128xf32>
    %11 = arith.addf %8, %10 : vector<8x128xf32>
    %cst_9 = arith.constant 0.000000e+00 : f32
    %12 = vector.broadcast %cst_9 : f32 to vector<8x128xf32>
    %13 = arith.maximumf %11, %12 : vector<8x128xf32>
    %c0_10 = arith.constant 0 : index
    %c0_11 = arith.constant 0 : index
    %14 = vector.load %arg2[%c0_10, %c0_11] : memref<8x128xf32, #tpu.memory_space<vmem>>, vector<8x128xf32>
    %15 = arith.addf %13, %14 : vector<8x128xf32>
    %c0_12 = arith.constant 0 : index
    %c0_13 = arith.constant 0 : index
    %16 = vector.load %arg7[%c0_12, %c0_13] : memref<128x128xf32, #tpu.memory_space<vmem>>, vector<128x128xf32>
    %cst_14 = arith.constant dense<0.000000e+00> : vector<8x128xf32>
    %17 = tpu.matmul %15, %16, %cst_14 {dimension_numbers = #tpu.dot_dimension_numbers<[1], [0], [0], [1], [0, 0, 1, 1], [], []>} : vector<8x128xf32>, vector<128x128xf32>, vector<8x128xf32> -> vector<8x128xf32>
    %c0_15 = arith.constant 0 : index
    %c0_16 = arith.constant 0 : index
    %18 = vector.load %arg8[%c0_15, %c0_16] : memref<1x128xf32, #tpu.memory_space<vmem>>, vector<1x128xf32>
    %19 = vector.broadcast %18 : vector<1x128xf32> to vector<8x128xf32>
    %20 = arith.addf %17, %19 : vector<8x128xf32>
    %cst_17 = arith.constant 0.000000e+00 : f32
    %21 = vector.broadcast %cst_17 : f32 to vector<8x128xf32>
    %22 = arith.maximumf %20, %21 : vector<8x128xf32>
    %c0_18 = arith.constant 0 : index
    %c0_19 = arith.constant 0 : index
    %23 = vector.load %arg9[%c0_18, %c0_19] : memref<128x256xf32, #tpu.memory_space<vmem>>, vector<128x256xf32>
    %cst_20 = arith.constant dense<0.000000e+00> : vector<8x256xf32>
    %24 = tpu.matmul %22, %23, %cst_20 {dimension_numbers = #tpu.dot_dimension_numbers<[1], [0], [0], [1], [0, 0, 1, 1], [], []>} : vector<8x128xf32>, vector<128x256xf32>, vector<8x256xf32> -> vector<8x256xf32>
    %c0_21 = arith.constant 0 : index
    %c0_22 = arith.constant 0 : index
    %25 = vector.load %arg10[%c0_21, %c0_22] : memref<1x256xf32, #tpu.memory_space<vmem>>, vector<1x256xf32>
    %26 = vector.broadcast %25 : vector<1x256xf32> to vector<8x256xf32>
    %27 = arith.addf %24, %26 : vector<8x256xf32>
    %cst_23 = arith.constant 0.000000e+00 : f32
    %28 = vector.broadcast %cst_23 : f32 to vector<8x256xf32>
    %29 = arith.maximumf %27, %28 : vector<8x256xf32>
    %c0_24 = arith.constant 0 : index
    %c0_25 = arith.constant 0 : index
    %30 = vector.load %arg11[%c0_24, %c0_25] : memref<256x128xf32, #tpu.memory_space<vmem>>, vector<256x128xf32>
    %cst_26 = arith.constant dense<0.000000e+00> : vector<8x128xf32>
    %31 = tpu.matmul %29, %30, %cst_26 {dimension_numbers = #tpu.dot_dimension_numbers<[1], [0], [0], [1], [0, 0, 1, 1], [], []>} : vector<8x256xf32>, vector<256x128xf32>, vector<8x128xf32> -> vector<8x128xf32>
    %c0_27 = arith.constant 0 : index
    %c0_28 = arith.constant 0 : index
    %32 = vector.load %arg12[%c0_27, %c0_28] : memref<1x128xf32, #tpu.memory_space<vmem>>, vector<1x128xf32>
    %33 = vector.broadcast %32 : vector<1x128xf32> to vector<8x128xf32>
    %34 = arith.addf %31, %33 : vector<8x128xf32>
    %c0_29 = arith.constant 0 : index
    %c0_30 = arith.constant 0 : index
    %35 = vector.load %arg13[%c0_29, %c0_30] : memref<8x128xf32, #tpu.memory_space<vmem>>, vector<8x128xf32>
    tpu.vector_store %arg13[%c0_29, %c0_30], %34 {strides = array<i32>} : memref<8x128xf32, #tpu.memory_space<vmem>>, vector<8x128xf32>,
    return
  }
  func.func @transform_0(%arg0: i32) -> (i32, i32) {
    %c0_i32 = arith.constant 0 : i32
    %c0_i32_0 = arith.constant 0 : i32
    return %arg0, %c0_i32 : i32, i32
  }
  func.func @transform_1(%arg0: i32) -> (i32, i32) {
    %c0_i32 = arith.constant 0 : i32
    %c0_i32_0 = arith.constant 0 : i32
    return %arg0, %c0_i32 : i32, i32
  }
  func.func @transform_2(%arg0: i32) -> (i32, i32) {
    %c0_i32 = arith.constant 0 : i32
    %c0_i32_0 = arith.constant 0 : i32
    %c0_i32_1 = arith.constant 0 : i32
    return %c0_i32, %c0_i32_0 : i32, i32
  }
  func.func @transform_3(%arg0: i32) -> (i32, i32) {
    %c0_i32 = arith.constant 0 : i32
    %c0_i32_0 = arith.constant 0 : i32
    %c0_i32_1 = arith.constant 0 : i32
    return %c0_i32, %c0_i32_0 : i32, i32
  }
  func.func @transform_4(%arg0: i32) -> (i32, i32) {
    %c0_i32 = arith.constant 0 : i32
    %c0_i32_0 = arith.constant 0 : i32
    %c0_i32_1 = arith.constant 0 : i32
    return %c0_i32, %c0_i32_0 : i32, i32
  }
  func.func @transform_5(%arg0: i32) -> (i32, i32) {
    %c0_i32 = arith.constant 0 : i32
    %c0_i32_0 = arith.constant 0 : i32
    %c0_i32_1 = arith.constant 0 : i32
    return %c0_i32, %c0_i32_0 : i32, i32
  }
  func.func @transform_6(%arg0: i32) -> (i32, i32) {
    %c0_i32 = arith.constant 0 : i32
    %c0_i32_0 = arith.constant 0 : i32
    %c0_i32_1 = arith.constant 0 : i32
    return %c0_i32, %c0_i32_0 : i32, i32
  }
  func.func @transform_7(%arg0: i32) -> (i32, i32) {
    %c0_i32 = arith.constant 0 : i32
    %c0_i32_0 = arith.constant 0 : i32
    %c0_i32_1 = arith.constant 0 : i32
    return %c0_i32, %c0_i32_0 : i32, i32
  }
  func.func @transform_8(%arg0: i32) -> (i32, i32) {
    %c0_i32 = arith.constant 0 : i32
    %c0_i32_0 = arith.constant 0 : i32
    %c0_i32_1 = arith.constant 0 : i32
    return %c0_i32, %c0_i32_0 : i32, i32
  }
  func.func @transform_9(%arg0: i32) -> (i32, i32) {
    %c0_i32 = arith.constant 0 : i32
    %c0_i32_0 = arith.constant 0 : i32
    %c0_i32_1 = arith.constant 0 : i32
    return %c0_i32, %c0_i32_0 : i32, i32
  }
  func.func @transform_10(%arg0: i32) -> (i32, i32) {
    %c0_i32 = arith.constant 0 : i32
    %c0_i32_0 = arith.constant 0 : i32
    %c0_i32_1 = arith.constant 0 : i32
    return %c0_i32, %c0_i32_0 : i32, i32
  }
  func.func @transform_11(%arg0: i32) -> (i32, i32) {
    %c0_i32 = arith.constant 0 : i32
    %c0_i32_0 = arith.constant 0 : i32
    %c0_i32_1 = arith.constant 0 : i32
    return %c0_i32, %c0_i32_0 : i32, i32
  }
  func.func @transform_12(%arg0: i32) -> (i32, i32) {
    %c0_i32 = arith.constant 0 : i32
    %c0_i32_0 = arith.constant 0 : i32
    return %arg0, %c0_i32 : i32, i32
  }
}

</mosaic_0001>

<bundles_post_ra>
// kernel: tpu_custom_call.1
= control target key start
LH: loop header
LB: loop body
LE: loop exit
PB: predicated region body
PF: predicated region fallthrough
CT: control target
= control target key end

     0   :  { %17 = vsyncpa [#allocation3], 0  ;;  %s1040_s0 = inlined_call_operand.hbm [shape: f32[8,128], index: 0, kind: input, shape index: {}]   ;;  %s1041_s1 = inlined_call_operand.hbm [shape: f32[8,128], index: 1, kind: input, shape index: {}]   ;;  %s1042_s2 = inlined_call_operand.vmem [shape: f32[1,128], index: 2, kind: input, shape index: {}]   ;;  %s1043_s3 = inlined_call_operand.vmem [shape: f32[1,128], index: 3, kind: input, shape index: {}]   ;;  %s1044_s4 = inlined_call_operand.hbm [shape: f32[128,128], index: 4, kind: input, shape index: {}]   ;;  %s1045_s5 = inlined_call_operand.vmem [shape: f32[1,128], index: 5, kind: input, shape index: {}]   ;;  %s1046_s6 = inlined_call_operand.hbm [shape: f32[128,128], index: 6, kind: input, shape index: {}]   ;;  %s1047_s7 = inlined_call_operand.vmem [shape: f32[1,128], index: 7, kind: input, shape index: {}]   ;;  %s1048_s8 = inlined_call_operand.hbm [shape: f32[128,256], index: 8, kind: input, shape index: {}]   ;;  %s1049_s9 = inlined_call_operand.vmem [shape: f32[1,256], index: 9, kind: input, shape index: {}]   ;;  %s1050_s10 = inlined_call_operand.hbm [shape: f32[256,128], index: 10, kind: input, shape index: {}]   ;;  %s1051_s11 = inlined_call_operand.vmem [shape: f32[1,128], index: 11, kind: input, shape index: {}]   ;;  %s1052_s12 = inlined_call_operand.hbm [shape: f32[8,128], index: 12, kind: output, shape index: {}]  }
   0x1   :  { %18 = vsyncpa [#allocation6], 0 }
   0x2   :  { %19 = vsyncpa [#allocation9], 0 }
   0x3   :  { %20 = vsyncpa [#allocation12], 0 }
   0x4   :  { %21 = vsyncpa [#allocation4], 0  ;;  %s879_s21 = smov [#allocation5]  }
   0x5   :  { %s38_s22 = sshll.u32 %s879_s21, 4  ;;  %s39_s22 = int_to_ptr.vmem [resolvable:$true] %s38_s22 }
   0x6   :  { %s737_s23 = scalar_lea.vmem %s39_s22, 128  ;;  %p742_p1 = scmp.lt.s32.totalorder %s39_s22, %s39_s22 }
   0x7   :  { %p738_p0 = scmp.ne.s32.totalorder %s39_s22, %s737_s23  ;;  %p743_p2 = scmp.lt.s32.totalorder %s737_s23, %s737_s23 }
   0x9   :  { %p744_p3 = por %p743_p2, %p742_p1 }
   0xb   :  { %p745_p4 = pnand %p744_p3, %p738_p0 }
   0xd   :  { %748 = shalt.err (!%p745_p4)
}
   0xe   :  { %41 = dma.hbm_to_vmem [thread:$0]  %s1041_s1, 128, %s39_s22, [#allocation6]  }
   0xf   :  { %s880_s26 = smov [#allocation8]   ;;  %s881_s28 = smov [#allocation2]  }
  0x10   :  { %s65_s27 = sshll.u32 %s880_s26, 4  ;;  %s28_s29 = sshll.u32 %s881_s28, 4  ;;  %s66_s27 = int_to_ptr.vmem [resolvable:$true] %s65_s27  ;;  %s29_s29 = int_to_ptr.vmem [resolvable:$true] %s28_s29 }
  0x11   :  { %s757_s30 = scalar_lea.vmem %s66_s27, 2048  ;;  %p762_p6 = scmp.lt.s32.totalorder %s66_s27, %s66_s27 }
  0x12   :  { %p758_p5 = scmp.ne.s32.totalorder %s66_s27, %s757_s30  ;;  %p763_p7 = scmp.lt.s32.totalorder %s757_s30, %s757_s30 }
  0x14   :  { %p764_p8 = por %p763_p7, %p762_p6 }
  0x16   :  { %p765_p9 = pnand %p764_p8, %p758_p5 }
  0x18   :  { %768 = shalt.err (!%p765_p9)
}
  0x19   :  { %s882_s13 = smov 128   ;;  %s883_s14 = smov 8  }
  0x1a   :  { %71 = dma.hbm_to_vmem [thread:$0]  %s1046_s6, 2048, %s66_s27, [#allocation9], %s882_s13, %s882_s13, %s883_s14  }
  0x1b   :  { %s777_s1 = scalar_lea.vmem %s29_s29, 128  ;;  %p782_p11 = scmp.lt.s32.totalorder %s29_s29, %s29_s29 }
  0x1c   :  { %p778_p10 = scmp.ne.s32.totalorder %s29_s29, %s777_s1  ;;  %p783_p12 = scmp.lt.s32.totalorder %s777_s1, %s777_s1 }
  0x1e   :  { %p784_p13 = por %p783_p12, %p782_p11 }
  0x20   :  { %p785_p0 = pnand %p784_p13, %p778_p10 }
  0x22   :  { %788 = shalt.err (!%p785_p0)
}
  0x23   :  { %31 = dma.hbm_to_vmem [thread:$0]  %s1040_s0, 128, %s29_s29, [#allocation3]  }
  0x24   :  { %s884_s19 = smov [#allocation7]   ;;  %s885_s21 = smov [#allocation10]  }
  0x25   :  { %s51_s20 = sshll.u32 %s884_s19, 4  ;;  %s79_s22 = sshll.u32 %s885_s21, 4  ;;  %s52_s20 = int_to_ptr.vmem [resolvable:$true] %s51_s20  ;;  %s80_s22 = int_to_ptr.vmem [resolvable:$true] %s79_s22 }
  0x26   :  { %s797_s23 = scalar_lea.vmem %s52_s20, 2048  ;;  %p802_p2 = scmp.lt.s32.totalorder %s52_s20, %s52_s20 }
  0x27   :  { %p798_p1 = scmp.ne.s32.totalorder %s52_s20, %s797_s23  ;;  %p803_p3 = scmp.lt.s32.totalorder %s797_s23, %s797_s23 }
  0x29   :  { %p804_p4 = por %p803_p3, %p802_p2 }
  0x2b   :  { %p805_p5 = pnand %p804_p4, %p798_p1 }
  0x2d   :  { %808 = shalt.err (!%p805_p5)
}
  0x2e   :  { %57 = dma.hbm_to_vmem [thread:$0]  %s1044_s4, 2048, %s52_s20, [#allocation6], %s882_s13, %s882_s13, %s883_s14  }
  0x2f   :  { %s817_s0 = scalar_lea.vmem %s80_s22, 4096  ;;  %p822_p7 = scmp.lt.s32.totalorder %s80_s22, %s80_s22 }
  0x30   :  { %p818_p6 = scmp.ne.s32.totalorder %s80_s22, %s817_s0  ;;  %p823_p8 = scmp.lt.s32.totalorder %s817_s0, %s817_s0 }
  0x32   :  { %p824_p9 = por %p823_p8, %p822_p7 }
  0x34   :  { %p825_p10 = pnand %p824_p9, %p818_p6 }
  0x36   :  { %828 = shalt.err (!%p825_p10)
}
  0x37   :  { %s886_s25 = smov 256   ;;  %s887_s26 = smov 16  }
  0x38   :  { %85 = dma.hbm_to_vmem [thread:$0]  %s1048_s8, 4096, %s80_s22, [#allocation9], %s886_s25, %s886_s25, %s887_s26  }
  0x39   :  { %s888_s29 = smov [#allocation11]  }
  0x3a   :  { %s93_s30 = sshll.u32 %s888_s29, 4  ;;  %s94_s30 = int_to_ptr.vmem [resolvable:$true] %s93_s30 }
  0x3b   :  { %s837_s15 = scalar_lea.vmem %s94_s30, 4096  ;;  %p842_p12 = scmp.lt.s32.totalorder %s94_s30, %s94_s30 }
  0x3c   :  { %p838_p11 = scmp.ne.s32.totalorder %s94_s30, %s837_s15  ;;  %p843_p13 = scmp.lt.s32.totalorder %s837_s15, %s837_s15 }
  0x3e   :  { %p844_p0 = por %p843_p13, %p842_p12 }
  0x40   :  { %p845_p1 = pnand %p844_p0, %p838_p11 }
  0x42   :  { %848 = shalt.err (!%p845_p1)
}
  0x43   :  { %99 = dma.hbm_to_vmem [thread:$0]  %s1050_s10, 4096, %s94_s30, [#allocation12], %s882_s13, %s882_s13, %s883_s14  }
  0x44   :  { %869 = dma.done.wait [#allocation3], 128  }
  0x45   :  { %870 = vsyncadd [#allocation3], 4294967168 }
  0x46   :  { %871 = dma.done.wait [#allocation6], 2176  }
  0x47   :  { %872 = vsyncadd [#allocation6], 4294965120 }
  0x48   :  { %873 = dma.done.wait [#allocation9], 6144  }
  0x49   :  { %874 = vsyncadd [#allocation9], 4294961152 }
  0x4a   :  { %875 = dma.done.wait [#allocation12], 4096  }
  0x4b   :  { %876 = vsyncadd [#allocation12], 4294963200  ;;  %v889_v0 = vmov 0.0   ;;  %vm890_vm0 = vmmov 0   ;;  %v152_v1 = vld [vmem:[#allocation7 + $0x78] sm:$0xff]  ;;  %v151_v2 = vld [vmem:[#allocation7 + $0x70] sm:$0xff] }
  0x4c   :  { %646 = vmatprep.subr.mxu0 %v889_v0  ;;  %678 = vmatprep.mubr.msk.f32.mxu0 %vm890_vm0, %v889_v0  ;;  %v150_v3 = vld [vmem:[#allocation7 + $0x68] sm:$0xff]  ;;  %v149_v4 = vld [vmem:[#allocation7 + $0x60] sm:$0xff]  ;;  %v148_v5 = vld [vmem:[#allocation7 + $0x58] sm:$0xff]  ;;  %s891_s20 = smov [#allocation13]  }
  0x4d   :  { %681 = vmatprep.subr.mxu1 %v889_v0  ;;  %713 = vmatprep.mubr.msk.f32.mxu1 %vm890_vm0, %v889_v0  ;;  %v248_v6 = vld [vmem:[#allocation8 + $0x78] sm:$0xff]  ;;  %v247_v7 = vld [vmem:[#allocation8 + $0x70] sm:$0xff]  ;;  %v246_v9 = vld [vmem:[#allocation8 + $0x68] sm:$0xff]  ;;  %s560_s21 = sshll.u32 %s891_s20, 4  ;;  %s561_s21 = int_to_ptr.vmem [resolvable:$true] %s560_s21 }
  0x4e   :  { %647 = vmatpush3.msra.mxu0 %v152_v1  ;;  %682 = vmatpush3.msra.mxu1 %v248_v6  ;;  %v147_v8 = vld [vmem:[#allocation7 + $0x50] sm:$0xff]  ;;  %v146_v10 = vld [vmem:[#allocation7 + $0x48] sm:$0xff]  ;;  %v245_v11 = vld [vmem:[#allocation8 + $0x60] sm:$0xff]  ;;  %p854_p3 = scmp.lt.s32.totalorder %s561_s21, %s561_s21 }
  0x4f   :  { %648 = vmatprep.subr.mxu0 %v889_v0  ;;  %683 = vmatprep.subr.mxu1 %v889_v0  ;;  %v145_v12 = vld [vmem:[#allocation7 + $0x40] sm:$0xff]  ;;  %v244_v13 = vld [vmem:[#allocation8 + $0x58] sm:$0xff]  ;;  %v243_v15 = vld [vmem:[#allocation8 + $0x50] sm:$0xff] }
  0x50   :  { %649 = vmatpush3.msra.mxu0 %v151_v2  ;;  %684 = vmatpush3.msra.mxu1 %v247_v7  ;;  %v144_v14 = vld [vmem:[#allocation7 + $0x38] sm:$0xff]  ;;  %v143_v16 = vld [vmem:[#allocation7 + $0x30] sm:$0xff]  ;;  %v242_v17 = vld [vmem:[#allocation8 + $0x48] sm:$0xff] }
  0x51   :  { %650 = vmatprep.subr.mxu0 %v889_v0  ;;  %685 = vmatprep.subr.mxu1 %v889_v0  ;;  %v142_v18 = vld [vmem:[#allocation7 + $0x28] sm:$0xff]  ;;  %v241_v19 = vld [vmem:[#allocation8 + $0x40] sm:$0xff]  ;;  %v240_v21 = vld [vmem:[#allocation8 + $0x38] sm:$0xff] }
  0x52   :  { %651 = vmatpush3.msra.mxu0 %v150_v3  ;;  %686 = vmatpush3.msra.mxu1 %v246_v9  ;;  %v141_v20 = vld [vmem:[#allocation7 + $0x20] sm:$0xff]  ;;  %v120_v22 = vld [vmem:[#allocation2] sm:$0xff]  ;;  %v140_v24 = vld [vmem:[#allocation7 + $0x18] sm:$0xff] }
  0x53   :  { %652 = vmatprep.subr.mxu0 %v889_v0  ;;  %687 = vmatprep.subr.mxu1 %v889_v0  ;;  %v572_v23 = vld [vmem:[%s1042_s2] ss:$0 sm:$0xff]  ;;  %v238_v28 = vld [vmem:[#allocation8 + $0x28] sm:$0xff]  ;;  %v237_v31 = vld [vmem:[#allocation8 + $0x20] sm:$0xff] }
  0x54   :  { %653 = vmatpush3.msra.mxu0 %v149_v4  ;;  %688 = vmatpush3.msra.mxu1 %v245_v11  ;;  %v239_v25 = vld [vmem:[#allocation8 + $0x30] sm:$0xff]  ;;  %v128_v27 = vmul.f32 %v572_v23, %v120_v22  ;;  %v138_v30 = vld [vmem:[#allocation7 + $0x8] sm:$0xff]  ;;  %v137_v32 = vld [vmem:[#allocation7] sm:$0xff] }
  0x55   :  { %654 = vmatprep.subr.mxu0 %v889_v0  ;;  %689 = vmatprep.subr.mxu1 %v889_v0  ;;  %v139_v26 = vld [vmem:[#allocation7 + $0x10] sm:$0xff]  ;;  %v236_v34 = vld [vmem:[#allocation8 + $0x18] sm:$0xff]  ;;  %v234_v36 = vld [vmem:[#allocation8 + $0x8] sm:$0xff] }
  0x56   :  { %655 = vmatpush3.msra.mxu0 %v148_v5  ;;  %690 = vmatpush3.msra.mxu1 %v244_v13  ;;  %v573_v29 = vld [vmem:[%s1043_s3] ss:$0 sm:$0xff]  ;;  %v233_v37 = vld [vmem:[#allocation8] sm:$0xff]  ;;  %v358_v38 = vld [vmem:[#allocation10 + $0xf8] sm:$0xff] }
  0x57   :  { %656 = vmatprep.subr.mxu0 %v889_v0  ;;  %691 = vmatprep.subr.mxu1 %v889_v0  ;;  %v136_v33 = vadd.f32 %v573_v29, %v128_v27  ;;  %v235_v35 = vld [vmem:[#allocation8 + $0x10] sm:$0xff]  ;;  %v356_v40 = vld [vmem:[#allocation10 + $0xe8] sm:$0xff]  ;;  %v355_v41 = vld [vmem:[#allocation10 + $0xe0] sm:$0xff] }
  0x58   :  { %657 = vmatpush3.msra.mxu0 %v147_v8  ;;  %692 = vmatpush3.msra.mxu1 %v243_v15  ;;  %v357_v39 = vld [vmem:[#allocation10 + $0xf0] sm:$0xff]  ;;  %v354_v42 = vld [vmem:[#allocation10 + $0xd8] sm:$0xff]  ;;  %v352_v44 = vld [vmem:[#allocation10 + $0xc8] sm:$0xff] }
  0x59   :  { %658 = vmatprep.subr.mxu0 %v889_v0  ;;  %693 = vmatprep.subr.mxu1 %v889_v0  ;;  %v353_v43 = vld [vmem:[#allocation10 + $0xd0] sm:$0xff]  ;;  %v351_v45 = vld [vmem:[#allocation10 + $0xc0] sm:$0xff]  ;;  %v350_v46 = vld [vmem:[#allocation10 + $0xb8] sm:$0xff] }
  0x5a   :  { %659 = vmatpush3.msra.mxu0 %v146_v10  ;;  %694 = vmatpush3.msra.mxu1 %v242_v17  ;;  %v349_v47 = vld [vmem:[#allocation10 + $0xb0] sm:$0xff]  ;;  %v348_v48 = vld [vmem:[#allocation10 + $0xa8] sm:$0xff]  ;;  %v347_v49 = vld [vmem:[#allocation10 + $0xa0] sm:$0xff] }
  0x5b   :  { %660 = vmatprep.subr.mxu0 %v889_v0  ;;  %695 = vmatprep.subr.mxu1 %v889_v0  ;;  %v346_v50 = vld [vmem:[#allocation10 + $0x98] sm:$0xff]  ;;  %v345_v51 = vld [vmem:[#allocation10 + $0x90] sm:$0xff]  ;;  %v344_v52 = vld [vmem:[#allocation10 + $0x88] sm:$0xff] }
  0x5c   :  { %661 = vmatpush3.msra.mxu0 %v145_v12  ;;  %696 = vmatpush3.msra.mxu1 %v241_v19  ;;  %v343_v53 = vld [vmem:[#allocation10 + $0x80] sm:$0xff]  ;;  %v342_v54 = vld [vmem:[#allocation10 + $0x78] sm:$0xff]  ;;  %v341_v55 = vld [vmem:[#allocation10 + $0x70] sm:$0xff] }
  0x5d   :  { %662 = vmatprep.subr.mxu0 %v889_v0  ;;  %697 = vmatprep.subr.mxu1 %v889_v0  ;;  %v340_v56 = vld [vmem:[#allocation10 + $0x68] sm:$0xff]  ;;  %v339_v57 = vld [vmem:[#allocation10 + $0x60] sm:$0xff]  ;;  %v338_v58 = vld [vmem:[#allocation10 + $0x58] sm:$0xff] }
  0x5e   :  { %663 = vmatpush3.msra.mxu0 %v144_v14  ;;  %698 = vmatpush3.msra.mxu1 %v240_v21  ;;  %v337_v59 = vld [vmem:[#allocation10 + $0x50] sm:$0xff]  ;;  %v336_v60 = vld [vmem:[#allocation10 + $0x48] sm:$0xff]  ;;  %v335_v61 = vld [vmem:[#allocation10 + $0x40] sm:$0xff] }
  0x5f   :  { %664 = vmatprep.subr.mxu0 %v889_v0  ;;  %699 = vmatprep.subr.mxu1 %v889_v0  ;;  %v334_v62 = vld [vmem:[#allocation10 + $0x38] sm:$0xff]  ;;  %v333_v63 = vld [vmem:[#allocation10 + $0x30] sm:$0xff]  ;;  %v331_v8 = vld [vmem:[#allocation10 + $0x20] sm:$0xff] }
  0x60   :  { %665 = vmatpush3.msra.mxu0 %v143_v16  ;;  %700 = vmatpush3.msra.mxu1 %v239_v25  ;;  %v574_v1 = vld [vmem:[%s1045_s5] ss:$0 sm:$0xff]  ;;  %v231_v4 = vld [vmem:[#allocation5] sm:$0xff]  ;;  %v328_v11 = vld [vmem:[#allocation10 + $0x8] sm:$0xff] }
  0x61   :  { %666 = vmatprep.subr.mxu0 %v889_v0  ;;  %701 = vmatprep.subr.mxu1 %v889_v0  ;;  %v330_v9 = vld [vmem:[#allocation10 + $0x18] sm:$0xff]  ;;  %v329_v10 = vld [vmem:[#allocation10 + $0x10] sm:$0xff]  ;;  %v327_v12 = vld [vmem:[#allocation10] sm:$0xff] }
  0x62   :  { %667 = vmatpush3.msra.mxu0 %v142_v18  ;;  %702 = vmatpush3.msra.mxu1 %v238_v28  ;;  %v475_v13 = vld [vmem:[#allocation11 + $0xf8] sm:$0xff]  ;;  %v474_v15 = vld [vmem:[#allocation11 + $0xf0] sm:$0xff]  ;;  %v473_v17 = vld [vmem:[#allocation11 + $0xe8] sm:$0xff] }
  0x63   :  { %668 = vmatprep.subr.mxu0 %v889_v0  ;;  %703 = vmatprep.subr.mxu1 %v889_v0  ;;  %v459_v14 = vld [vmem:[#allocation11 + $0x78] sm:$0xff]  ;;  %v458_v16 = vld [vmem:[#allocation11 + $0x70] sm:$0xff]  ;;  %v457_v18 = vld [vmem:[#allocation11 + $0x68] sm:$0xff] }
  0x64   :  { %669 = vmatpush3.msra.mxu0 %v141_v20  ;;  %704 = vmatpush3.msra.mxu1 %v237_v31  ;;  %v472_v19 = vld [vmem:[#allocation11 + $0xe0] sm:$0xff]  ;;  %v471_v21 = vld [vmem:[#allocation11 + $0xd8] sm:$0xff]  ;;  %v470_v23 = vld [vmem:[#allocation11 + $0xd0] sm:$0xff] }
  0x65   :  { %670 = vmatprep.subr.mxu0 %v889_v0  ;;  %705 = vmatprep.subr.mxu1 %v889_v0  ;;  %v456_v20 = vld [vmem:[#allocation11 + $0x60] sm:$0xff]  ;;  %v455_v22 = vld [vmem:[#allocation11 + $0x58] sm:$0xff]  ;;  %v469_v25 = vld [vmem:[#allocation11 + $0xc8] sm:$0xff] }
  0x66   :  { %671 = vmatpush3.msra.mxu0 %v140_v24  ;;  %706 = vmatpush3.msra.mxu1 %v236_v34  ;;  %v454_v24 = vld [vmem:[#allocation11 + $0x50] sm:$0xff]  ;;  %v468_v27 = vld [vmem:[#allocation11 + $0xc0] sm:$0xff]  ;;  %v467_v29 = vld [vmem:[#allocation11 + $0xb8] sm:$0xff] }
  0x67   :  { %672 = vmatprep.subr.mxu0 %v889_v0  ;;  %707 = vmatprep.subr.mxu1 %v889_v0  ;;  %v452_v28 = vld [vmem:[#allocation11 + $0x40] sm:$0xff]  ;;  %v466_v31 = vld [vmem:[#allocation11 + $0xb0] sm:$0xff]  ;;  %v449_v34 = vld [vmem:[#allocation11 + $0x28] sm:$0xff] }
  0x68   :  { %673 = vmatpush3.msra.mxu0 %v139_v26  ;;  %708 = vmatpush3.msra.mxu1 %v235_v35  ;;  %v453_v26 = vld [vmem:[#allocation11 + $0x48] sm:$0xff]  ;;  %v464_v35 = vld [vmem:[#allocation11 + $0xa0] sm:$0xff] }
  0x69   :  { %674 = vmatprep.subr.mxu0 %v889_v0  ;;  %709 = vmatprep.subr.mxu1 %v889_v0 }
  0x6a   :  { %675 = vmatpush3.msra.mxu0 %v138_v30  ;;  %710 = vmatpush3.msra.mxu1 %v234_v36  ;;  %v451_v30 = vld [vmem:[#allocation11 + $0x38] sm:$0xff]  ;;  %v448_v36 = vld [vmem:[#allocation11 + $0x20] sm:$0xff] }
  0x6b   :  { %676 = vmatprep.subr.mxu0 %v889_v0  ;;  %711 = vmatprep.subr.mxu1 %v889_v0 }
  0x6c   :  { %677 = vmatpush3.msra.mxu0 %v137_v32  ;;  %712 = vmatpush3.msra.mxu1 %v233_v37  ;;  %v450_v32 = vld [vmem:[#allocation11 + $0x30] sm:$0xff] }
  0x6d   :  { %679 = vmatmul.mubr.f32.vlgmr.msra.gmra.mxu0 %v136_v33  ;;  %371 = vmatprep.subr.mxu0 %v358_v38  ;;  %v465_v33 = vld [vmem:[#allocation11 + $0xa8] sm:$0xff]  ;;  %v575_v37 = vld [vmem:[%s1047_s7] ss:$0 sm:$0xff] }
  0x6e   :  { %435 = vmatprep.mubr.f32.mxu0 %v889_v0  ;;  %372 = vmatpush1.msra.mxu0 %v357_v39  ;;  %v332_v0 = vld [vmem:[#allocation10 + $0x28] sm:$0xff] }
  0x6f   :  { %373 = vmatprep.subr.mxu0 %v356_v40  ;;  %611 = vmatprep.subr.mxu1 %v475_v13 }
  0x70   :  { %374 = vmatpush1.msra.mxu0 %v355_v41 }
  0x71   :  { %375 = vmatprep.subr.mxu0 %v354_v42  ;;  %v463_v42 = vld [vmem:[#allocation11 + $0x98] sm:$0xff] }
  0x72   :  { %376 = vmatpush1.msra.mxu0 %v353_v43  ;;  %v447_v43 = vld [vmem:[#allocation11 + $0x18] sm:$0xff] }
  0x73   :  { %377 = vmatprep.subr.mxu0 %v352_v44  ;;  %v462_v44 = vld [vmem:[#allocation11 + $0x90] sm:$0xff] }
  0x74   :  { %378 = vmatpush1.msra.mxu0 %v351_v45  ;;  %v446_v45 = vld [vmem:[#allocation11 + $0x10] sm:$0xff] }
  0x75   :  { %379 = vmatprep.subr.mxu0 %v350_v46  ;;  %v461_v46 = vld [vmem:[#allocation11 + $0x88] sm:$0xff] }
  0x76   :  { %380 = vmatpush1.msra.mxu0 %v349_v47  ;;  %v445_v47 = vld [vmem:[#allocation11 + $0x8] sm:$0xff] }
  0x77   :  { %381 = vmatprep.subr.mxu0 %v348_v48  ;;  %v460_v48 = vld [vmem:[#allocation11 + $0x80] sm:$0xff] }
  0x78   :  { %382 = vmatpush1.msra.mxu0 %v347_v49  ;;  %v444_v49 = vld [vmem:[#allocation11] sm:$0xff] }
  0x79   :  { %383 = vmatprep.subr.mxu0 %v346_v50  ;;  %v361_v50 = vlaneseq }
  0x7a   :  { %384 = vmatpush1.msra.mxu0 %v345_v51 }
  0x7b   :  { %385 = vmatprep.subr.mxu0 %v344_v52  ;;  %v362_v51 = vshrl.u32 %v361_v50, 7 }
  0x7c   :  { %386 = vmatpush1.msra.mxu0 %v343_v53  ;;  %v359_v53 = vld [vmem:[%s1049_s9] sm:$0x3]  ;;  %s849_s9 = scalar_lea.vmem %s561_s21, 128 }
  0x7d   :  { %387 = vmatprep.subr.mxu0 %v342_v54  ;;  %v363_v52 = vsub.s32 0, %v362_v51  ;;  %v367_v54 = vsub.s32 1, %v362_v51  ;;  %p850_p2 = scmp.ne.s32.totalorder %s561_s21, %s849_s9  ;;  %p855_p4 = scmp.lt.s32.totalorder %s849_s9, %s849_s9 }
  0x7e   :  { %388 = vmatpush1.msra.mxu0 %v341_v55 }
  0x7f   :  { %389 = vmatprep.subr.mxu0 %v340_v56  ;;  %v364_v55 = vrot.slane %v359_v53, %v363_v52  ;;  %v368_v56 = vrot.slane %v359_v53, %v367_v54  ;;  %p856_p5 = por %p855_p4, %p854_p3 }
  0x80   :  { %390 = vmatpush1.msra.mxu0 %v339_v57 }
  0x81   :  { %391 = vmatprep.subr.mxu0 %v338_v58  ;;  %p857_p6 = pnand %p856_p5, %p850_p2 }
  0x82   :  { %392 = vmatpush1.msra.mxu0 %v337_v59 }
  0x83   :  { %393 = vmatprep.subr.mxu0 %v336_v60 }
  0x84   :  { %394 = vmatpush1.msra.mxu0 %v335_v61 }
  0x85   :  { %395 = vmatprep.subr.mxu0 %v334_v62 }
  0x86   :  { %396 = vmatpush1.msra.mxu0 %v333_v63 }
  0x87   :  { %397 = vmatprep.subr.mxu0 %v332_v0  ;;  %v576_v0 = vld [vmem:[%s1051_s11] ss:$0 sm:$0xff] }
  0x88   :  { %398 = vmatpush1.msra.mxu0 %v331_v8 }
  0x89   :  { %399 = vmatprep.subr.mxu0 %v330_v9 }
  0x8a   :  { %400 = vmatpush1.msra.mxu0 %v329_v10 }
  0x8b   :  { %401 = vmatprep.subr.mxu0 %v328_v11 }
  0x8c   :  { %402 = vmatpush1.msra.mxu0 %v327_v12 }
 0x12d   :  { %v226_v2 = vpop.f32.mrf.mxu0 }
 0x12e   :  { %v227_v3 = vadd.f32 %v574_v1, %v226_v2 }
 0x12f   :  { %v680_v5 = vpop.f32.mrf.mxu0 }
 0x130   :  { %v230_v6 = vmax.f32 %v227_v3, 0.0 }
 0x132   :  { %v232_v7 = vadd.f32 %v231_v4, %v230_v6 }
 0x134   :  { %714 = vmatmul.mubr.f32.vlgmr.msra.gmra.mxu1 %v232_v7 }
 0x135   :  { %612 = vmatpush3.msra.mxu1 %v459_v14 }
 0x136   :  { %613 = vmatprep.subr.mxu1 %v474_v15 }
 0x137   :  { %614 = vmatpush3.msra.mxu1 %v458_v16 }
 0x138   :  { %615 = vmatprep.subr.mxu1 %v473_v17 }
 0x139   :  { %616 = vmatpush3.msra.mxu1 %v457_v18 }
 0x13a   :  { %617 = vmatprep.subr.mxu1 %v472_v19 }
 0x13b   :  { %618 = vmatpush3.msra.mxu1 %v456_v20 }
 0x13c   :  { %619 = vmatprep.subr.mxu1 %v471_v21 }
 0x13d   :  { %620 = vmatpush3.msra.mxu1 %v455_v22 }
 0x13e   :  { %621 = vmatprep.subr.mxu1 %v470_v23 }
 0x13f   :  { %622 = vmatpush3.msra.mxu1 %v454_v24 }
 0x140   :  { %623 = vmatprep.subr.mxu1 %v469_v25 }
 0x141   :  { %624 = vmatpush3.msra.mxu1 %v453_v26 }
 0x142   :  { %625 = vmatprep.subr.mxu1 %v468_v27 }
 0x143   :  { %626 = vmatpush3.msra.mxu1 %v452_v28 }
 0x144   :  { %627 = vmatprep.subr.mxu1 %v467_v29 }
 0x145   :  { %628 = vmatpush3.msra.mxu1 %v451_v30 }
 0x146   :  { %629 = vmatprep.subr.mxu1 %v466_v31 }
 0x147   :  { %630 = vmatpush3.msra.mxu1 %v450_v32 }
 0x148   :  { %631 = vmatprep.subr.mxu1 %v465_v33 }
 0x149   :  { %632 = vmatpush3.msra.mxu1 %v449_v34 }
 0x14a   :  { %633 = vmatprep.subr.mxu1 %v464_v35 }
 0x14b   :  { %634 = vmatpush3.msra.mxu1 %v448_v36 }
 0x14c   :  { %635 = vmatprep.subr.mxu1 %v463_v42 }
 0x14d   :  { %636 = vmatpush3.msra.mxu1 %v447_v43 }
 0x14e   :  { %637 = vmatprep.subr.mxu1 %v462_v44 }
 0x14f   :  { %638 = vmatpush3.msra.mxu1 %v446_v45 }
 0x150   :  { %639 = vmatprep.subr.mxu1 %v461_v46 }
 0x151   :  { %640 = vmatpush3.msra.mxu1 %v445_v47 }
 0x152   :  { %641 = vmatprep.subr.mxu1 %v460_v48 }
 0x153   :  { %642 = vmatpush3.msra.mxu1 %v444_v49 }
 0x1f4   :  { %v322_v38 = vpop.f32.mrf.mxu1 }
 0x1f5   :  { %v323_v39 = vadd.f32 %v575_v37, %v322_v38 }
 0x1f6   :  { %v715_v40 = vpop.f32.mrf.mxu1 }
 0x1f7   :  { %v326_v41 = vmax.f32 %v323_v39, 0.0 }
 0x1f9   :  { %436 = vmatmul.mubr.f32.vlgmr.msra.gmra.mxu0 %v326_v41 }
 0x2b9   :  { %v437_v57 = vpop.f32.mrf.mxu0 }
 0x2ba   :  { %v438_v58 = vadd.f32 %v437_v57, %v364_v55 }
 0x2bb   :  { %v439_v59 = vpop.f32.mrf.mxu0 }
 0x2bc   :  { %v440_v60 = vadd.f32 %v439_v59, %v368_v56  ;;  %v442_v62 = vmax.f32 %v438_v58, 0.0 }
 0x2be   :  { %v443_v61 = vmax.f32 %v440_v60, 0.0 }
 0x2c0   :  { %547 = vmatprep.mubr.f32.mxu1 %v443_v61 }
 0x2c1   :  { %548 = vmatmul.mubr.f32.vlgmr.msra.gmra.mxu1 %v442_v62 }
 0x381   :  { %v643_v63 = vpop.f32.mrf.mxu1 }
 0x383   :  { %v644_v1 = vpop.f32.mrf.mxu1 }
 0x384   :  { %v645_v2 = vadd.f32 %v644_v1, %v643_v63 }
 0x386   :  { %v550_v3 = vadd.f32 %v645_v2, %v576_v0 }
 0x388   :  { %553 = vst [vmem:[#allocation13] sm:$0xff] %v550_v3 }
 0x389   :  { %860 = shalt.err (!%p857_p6)
}
 0x38a   :  { %563 = dma.vmem_to_hbm [thread:$0]  %s561_s21, 128, %s1052_s12, [#allocation4]  }
 0x38b   :  { %877 = dma.done.wait [#allocation4], 128  }
 0x38c   :  { %878 = vsyncadd [#allocation4], 4294967168 }
 0x38d   :  { %567 = vsyncpa [#allocation3], 1 }
 0x38e   :  { %568 = vsyncpa [#allocation6], 1 }
 0x38f   :  { %569 = vsyncpa [#allocation9], 1 }
 0x390   :  { %570 = vsyncpa [#allocation12], 1 }
 0x391   :  { %571 = vsyncpa [#allocation4], 1 }

</bundles_post_ra>
